<compile_context>
chip_gen: v7x
topology: tpu7x:2x2x1
jax: 0.10.0
libtpu: 0.0.40
codegen_flags: <defaults>
</compile_context>

<pallas_src>
import functools
import math

import jax
import jax.numpy as jnp
from jax.experimental import pallas as pl
from jax.experimental.pallas import tpu as pltpu

_LOG2 = float(math.log(2.0))  # matches nn.Parameter(log(2.)), requires_grad=False


def _shifted_softplus_kernel(x_ref, o_ref, *, shift):
    # Numerically stable softplus in f32: max(x, 0) + log1p(exp(-|x|)).
    x = x_ref[...].astype(jnp.float32)
    sp = jnp.maximum(x, 0.0) + jnp.log1p(jnp.exp(-jnp.abs(x)))
    o_ref[...] = (sp - shift).astype(o_ref.dtype)


def shifted_softplus(x: jax.Array) -> jax.Array:
    """Elementwise softplus(x) - log(2); x may be any shape (NCHW here)."""
    orig_shape = x.shape
    dtype = x.dtype
    n = x.size

    # Lane-dense 2-D slab. Prefer a wide lane dim that divides n (no padding).
    lane = next((l for l in (1024, 512, 256, 128) if n % l == 0), None)
    if lane is None:
        # Ragged element count (rare for NCHW activations): pad a flat copy.
        lane = 128
        rows = pl.cdiv(pl.cdiv(n, lane), 8) * 8
        x2d = jnp.pad(x.reshape(-1), (0, rows * lane - n)).reshape(rows, lane)
        padded = True
    else:
        rows = n // lane
        x2d = x.reshape(rows, lane)
        padded = False

    # Tile sizing: ~512 KiB per input tile (Pallas double-buffers in+out), so
    # the resident VMEM stays a few MiB regardless of input size.
    itemsize = jnp.dtype(dtype).itemsize
    target_rows = max(8, (512 * 1024) // (lane * itemsize))
    if rows <= target_rows:
        tile_rows = rows            # single tile; block == full array dims
    else:
        tile_rows = target_rows     # multiple of 8; ragged last block is masked
    grid = (pl.cdiv(rows, tile_rows),)

    kernel = functools.partial(_shifted_softplus_kernel, shift=_LOG2)

    out2d = pl.pallas_call(
        kernel,
        out_shape=jax.ShapeDtypeStruct((rows, lane), dtype),
        grid_spec=pltpu.PrefetchScalarGridSpec(
            num_scalar_prefetch=0,
            grid=grid,
            in_specs=[pl.BlockSpec((tile_rows, lane), lambda i: (i, 0))],
            out_specs=pl.BlockSpec((tile_rows, lane), lambda i: (i, 0)),
        ),
        compiler_params=pltpu.CompilerParams(
            dimension_semantics=("parallel",)),
    )(x2d)

    if padded:
        return out2d.reshape(-1)[:n].reshape(orig_shape)
    return out2d.reshape(orig_shape)


if __name__ == "__main__":
    key = jax.random.PRNGKey(0)

    # Primary case: matches the PyTorch module's NCHW usage.
    x = jax.random.normal(key, (2, 4, 16, 16), dtype=jnp.float32)
    y = jax.block_until_ready(shifted_softplus(x))
    ref = jax.nn.softplus(x) - _LOG2
    assert y.shape == x.shape and y.dtype == x.dtype
    assert jnp.max(jnp.abs(y - ref)) < 1e-5

    # Ragged element count -> exercises the pad fallback path.
    x2 = jax.random.normal(jax.random.PRNGKey(1), (3, 5, 7, 11), dtype=jnp.float32)
    y2 = jax.block_until_ready(shifted_softplus(x2))
    assert jnp.max(jnp.abs(y2 - (jax.nn.softplus(x2) - _LOG2))) < 1e-5

    # Larger case -> exercises the multi-tile pipelined grid.
    x3 = jax.random.normal(jax.random.PRNGKey(2), (4, 64, 64, 64), dtype=jnp.float32)
    y3 = jax.block_until_ready(shifted_softplus(x3))
    assert jnp.max(jnp.abs(y3 - (jax.nn.softplus(x3) - _LOG2))) < 1e-5

    print("KERNEL_OK")
</pallas_src>

<mosaic_0001>
module attributes {stable_mosaic.version = 11 : i64} {
  func.func @_shifted_softplus_kernel(%arg0: i32, %arg1: memref<2x1024xf32, #tpu.memory_space<vmem>>, %arg2: memref<2x1024xf32, #tpu.memory_space<vmem>>) attributes {dimension_semantics = [#tpu.dimension_semantics<parallel>], iteration_bounds = array<i64: 1>, scalar_prefetch = 0 : i64, scratch_operands = 0 : i64, tpu.core_type = #tpu.core_type<tc>, window_params = [{transform_indices = @transform_0, window_bounds = array<i64: 2, 1024>}, {transform_indices = @transform_1, window_bounds = array<i64: 2, 1024>}]} {
    %c0 = arith.constant 0 : index
    %c0_0 = arith.constant 0 : index
    %0 = vector.load %arg1[%c0, %c0_0] : memref<2x1024xf32, #tpu.memory_space<vmem>>, vector<2x1024xf32>
    %cst = arith.constant 0.000000e+00 : f32
    %1 = vector.broadcast %cst : f32 to vector<2x1024xf32>
    %2 = arith.maximumf %0, %1 : vector<2x1024xf32>
    %3 = math.absf %0 : vector<2x1024xf32>
    %cst_1 = arith.constant 0.000000e+00 : f32
    %4 = vector.broadcast %cst_1 : f32 to vector<2x1024xf32>
    %5 = arith.subf %4, %3 : vector<2x1024xf32>
    %6 = math.exp %5 : vector<2x1024xf32>
    %7 = math.log1p %6 : vector<2x1024xf32>
    %8 = arith.addf %2, %7 : vector<2x1024xf32>
    %cst_2 = arith.constant 0.693147182 : f32
    %9 = vector.broadcast %cst_2 : f32 to vector<2x1024xf32>
    %10 = arith.subf %8, %9 : vector<2x1024xf32>
    %c0_3 = arith.constant 0 : index
    %c0_4 = arith.constant 0 : index
    %11 = vector.load %arg2[%c0_3, %c0_4] : memref<2x1024xf32, #tpu.memory_space<vmem>>, vector<2x1024xf32>
    tpu.vector_store %arg2[%c0_3, %c0_4], %10 {strides = array<i32>} : memref<2x1024xf32, #tpu.memory_space<vmem>>, vector<2x1024xf32>,
    return
  }
  func.func @transform_0(%arg0: i32) -> (i32, i32) {
    %c0_i32 = arith.constant 0 : i32
    %c0_i32_0 = arith.constant 0 : i32
    return %arg0, %c0_i32 : i32, i32
  }
  func.func @transform_1(%arg0: i32) -> (i32, i32) {
    %c0_i32 = arith.constant 0 : i32
    %c0_i32_0 = arith.constant 0 : i32
    return %arg0, %c0_i32 : i32, i32
  }
}

</mosaic_0001>

<bundles_post_ra>
// kernel: tpu_custom_call.1
= control target key start
LH: loop header
LB: loop body
LE: loop exit
PB: predicated region body
PF: predicated region fallthrough
CT: control target
= control target key end

     0   :  { %6 = vsyncpa [#allocation3], 0  ;;  %s168_s0 = inlined_call_operand.hbm [shape: f32[2,1024], index: 0, kind: input, shape index: {}]   ;;  %s169_s1 = inlined_call_operand.hbm [shape: f32[2,1024], index: 1, kind: output, shape index: {}]  }
   0x1   :  { %7 = vsyncpa [#allocation4], 0  ;;  %s132_s6 = smov [#allocation2]   ;;  %s84_s10 = scalar_lea.hbm %s168_s0, 256 }
   0x2   :  { %s14_s7 = sshll.u32 %s132_s6, 4  ;;  %p85_p0 = scmp.ne.s32.totalorder %s168_s0, %s84_s10  ;;  %s15_s7 = int_to_ptr.vmem [resolvable:$true] %s14_s7 }
   0x3   :  { %p88_p1 = scmp.lt.u32.totalorder %s84_s10, %s168_s0 }
   0x5   :  { %p90_p2 = pnand %p88_p1, %p85_p0 }
   0x7   :  { %93 = shalt.err (!%p90_p2)
}
   0x8   :  { %s94_s15 = scalar_lea.vmem %s15_s7, 256  ;;  %p99_p4 = scmp.lt.s32.totalorder %s15_s7, %s15_s7 }
   0x9   :  { %p95_p3 = scmp.ne.s32.totalorder %s15_s7, %s94_s15  ;;  %p100_p5 = scmp.lt.s32.totalorder %s94_s15, %s94_s15 }
   0xb   :  { %p101_p6 = por %p100_p5, %p99_p4 }
   0xd   :  { %p102_p7 = pnand %p101_p6, %p95_p3 }
   0xf   :  { %105 = shalt.err (!%p102_p7)
}
  0x10   :  { %17 = dma.hbm_to_vmem [thread:$0]  %s168_s0, 256, %s15_s7, [#allocation3]  }
  0x11   :  { %128 = dma.done.wait [#allocation3], 256  }
  0x12   :  { %129 = vsyncadd [#allocation3], 4294967040  ;;  %v21_v0 = vld [vmem:[#allocation2] sm:$0xff]  ;;  %v22_v1 = vld [vmem:[#allocation2 + $0x8] sm:$0xff]  ;;  %s133_s0 = smov [#allocation5]  }
  0x13   :  { %v25_v2 = vand.u32 2147483647, %v21_v0  ;;  %v26_v3 = vand.u32 2147483647, %v22_v1  ;;  %v23_v20 = vmax.f32 %v21_v0, 0.0  ;;  %v24_v24 = vmax.f32 %v22_v1, 0.0 }
  0x14   :  { %s63_s18 = sshll.u32 %s133_s0, 4  ;;  %s64_s18 = int_to_ptr.vmem [resolvable:$true] %s63_s18 }
  0x15   :  { %v27_v4 = vsub.f32 0.0, %v25_v2  ;;  %v28_v5 = vsub.f32 0.0, %v26_v3  ;;  %s106_s19 = scalar_lea.vmem %s64_s18, 256  ;;  %p111_p9 = scmp.lt.s32.totalorder %s64_s18, %s64_s18 }
  0x16   :  { %p107_p8 = scmp.ne.s32.totalorder %s64_s18, %s106_s19  ;;  %p112_p10 = scmp.lt.s32.totalorder %s106_s19, %s106_s19 }
  0x17   :  { %v29_v6 = vmul.f32 1.442695, %v27_v4  ;;  %v31_v7 = vmul.f32 1.442695, %v28_v5 }
  0x18   :  { %p113_p11 = por %p112_p10, %p111_p9 }
  0x19   :  { %76 = vpow2.f32 %v29_v6 }
  0x1a   :  { %78 = vpow2.f32 %v31_v7  ;;  %p114_p12 = pnand %p113_p11, %p107_p8 }
  0x23   :  { %v77_v8 = vpop.eup %76 }
  0x24   :  { %v79_v9 = vpop.eup %78  ;;  %v33_v10 = vadd.f32 1.0, %v77_v8  ;;  %v36_v12 = vmul.f32 -0.5, %v77_v8  ;;  %v39_v15 = vand.u32 2147483647, %v77_v8 }
  0x25   :  { %v42_v11 = vadd.f32 1.0, %v79_v9  ;;  %v45_v13 = vmul.f32 -0.5, %v79_v9  ;;  %v48_v17 = vand.u32 2147483647, %v79_v9 }
  0x26   :  { %80 = vlog2.f32 %v33_v10  ;;  %v37_v14 = vadd.f32 1.0, %v36_v12  ;;  %vm40_vm0 = vcmp.lt.f32.partialorder %v39_v15, 0.0004427343 }
  0x27   :  { %82 = vlog2.f32 %v42_v11  ;;  %v46_v16 = vadd.f32 1.0, %v45_v13  ;;  %vm49_vm1 = vcmp.lt.f32.partialorder %v48_v17, 0.0004427343 }
  0x28   :  { %v38_v18 = vmul.f32 %v77_v8, %v37_v14 }
  0x29   :  { %v47_v21 = vmul.f32 %v79_v9, %v46_v16 }
  0x30   :  { %v81_v19 = vpop.eup %80 }
  0x31   :  { %v83_v22 = vpop.eup %82  ;;  %v35_v23 = vmul.f32 0.6931472, %v81_v19 }
  0x32   :  { %v44_v25 = vmul.f32 0.6931472, %v83_v22 }
  0x33   :  { %v41_v26 = vsel %vm40_vm0, %v38_v18, %v35_v23 }
  0x34   :  { %v51_v27 = vadd.f32 %v41_v26, %v23_v20  ;;  %v50_v28 = vsel %vm49_vm1, %v47_v21, %v44_v25 }
  0x35   :  { %v52_v29 = vadd.f32 %v50_v28, %v24_v24 }
  0x36   :  { %v72_v30 = vadd.f32 -0.6931472, %v51_v27 }
  0x37   :  { %v73_v31 = vadd.f32 -0.6931472, %v52_v29 }
  0x38   :  { %55 = vst [vmem:[#allocation5] sm:$0xff] %v72_v30 }
  0x39   :  { %56 = vst [vmem:[#allocation5 + $0x8] sm:$0xff] %v73_v31 }
  0x3a   :  { %117 = shalt.err (!%p114_p12)
}
  0x3b   :  { %s118_s22 = scalar_lea.hbm %s169_s1, 256 }
  0x3c   :  { %p119_p13 = scmp.ne.s32.totalorder %s169_s1, %s118_s22  ;;  %p122_p0 = scmp.lt.u32.totalorder %s118_s22, %s169_s1 }
  0x3e   :  { %p124_p1 = pnand %p122_p0, %p119_p13 }
  0x40   :  { %127 = shalt.err (!%p124_p1)
}
  0x41   :  { %66 = dma.vmem_to_hbm [thread:$0]  %s64_s18, 256, %s169_s1, [#allocation4]  }
  0x42   :  { %130 = dma.done.wait [#allocation4], 256  }
  0x43   :  { %131 = vsyncadd [#allocation4], 4294967040 }
  0x44   :  { %70 = vsyncpa [#allocation3], 1 }
  0x45   :  { %71 = vsyncpa [#allocation4], 1 }

</bundles_post_ra>
